<compile_context>
chip_gen: v7x
topology: tpu7x:2x2x1
jax: 0.10.0
libtpu: 0.0.40
codegen_flags: <defaults>
</compile_context>

<pallas_src>
import jax
import jax.numpy as jnp
import numpy as np
from jax.experimental import pallas as pl
from jax.experimental.pallas import tpu as pltpu


def _round_up(x, m):
    return (x + m - 1) // m * m


def _tqgc_kernel(nbw_ref, feat_ref, wflat_ref, out_ref):
    # nbw_ref:   (TM, N)         raw neighbourhood weights (N on lanes)
    # feat_ref:  (TM, N, F)      neighbourhood features
    # wflat_ref: (F, out_feat)   per-kernel linear weights, concatenated on out dim
    # out_ref:   (TM, out_feat)
    nbw = nbw_ref[...]                                         # (TM, N)
    # params cancel in the normalization (see module comment).
    w = nbw / jnp.sum(nbw, axis=1, keepdims=True)              # (TM, N)

    feat = feat_ref[...]                                       # (TM, N, F)
    # Per-row weighted sum over the neighbourhood: VPU multiply + sublane reduce.
    weighted = jnp.sum(w[:, :, None] * feat, axis=1)           # (TM, F)

    # All n_kernels linear layers fused into one MXU matmul.
    out = jnp.dot(weighted, wflat_ref[...],
                  preferred_element_type=jnp.float32)          # (TM, out_feat)
    out_ref[...] = out.astype(out_ref.dtype)


def text_query_graph_convolution(nb_features, nb_weights, params, w_stack):
    """
    nb_features: (B, K, N, in_feat)   float32
    nb_weights:  (B, K, N, 1)         float32   (K == n_word == N)
    params:      (1, n_kernels)       float32   (cancels in the normalization; unused)
    w_stack:     (n_kernels, in_feat, out_per_kernel)  float32
    returns:     (B, K, out_feat)     float32
    """
    del params  # mathematically cancels: nbw*p / sum(nbw*p) == nbw / sum(nbw)

    B, K, N, F = nb_features.shape
    n_kernels, _, opk = w_stack.shape
    out_feat = n_kernels * opk
    BK = B * K

    # Flatten (b, k) rows; drop the trailing singleton of nb_weights (N on lanes).
    feat = nb_features.reshape(BK, N, F)
    nbw = nb_weights.reshape(BK, N)

    # Concatenate per-kernel Linear weights along the output dim:
    # W_flat[:, j*opk:(j+1)*opk] == w_stack[j]
    w_flat = jnp.transpose(w_stack, (1, 0, 2)).reshape(F, out_feat)

    # Row tiling: batch as many rows as practical per grid step (one step here).
    TM = min(256, _round_up(BK, 8))
    BK_pad = _round_up(BK, TM)
    if BK_pad != BK:
        pad = BK_pad - BK
        feat = jnp.pad(feat, ((0, pad), (0, 0), (0, 0)))
        # pad weights with ones so padded rows don't produce 0/0
        nbw = jnp.pad(nbw, ((0, pad), (0, 0)), constant_values=1.0)

    grid = (BK_pad // TM,)

    out = pl.pallas_call(
        _tqgc_kernel,
        out_shape=jax.ShapeDtypeStruct((BK_pad, out_feat), jnp.float32),
        grid_spec=pl.GridSpec(
            grid=grid,
            in_specs=[
                pl.BlockSpec((TM, N), lambda i: (i, 0)),
                pl.BlockSpec((TM, N, F), lambda i: (i, 0, 0)),
                pl.BlockSpec((F, out_feat), lambda i: (0, 0)),  # resident weights
            ],
            out_specs=pl.BlockSpec((TM, out_feat), lambda i: (i, 0)),
        ),
        compiler_params=pltpu.CompilerParams(
            dimension_semantics=("parallel",)),
    )(nbw, feat, w_flat)

    return out[:BK].reshape(B, K, out_feat)


def _reference(nb_features, nb_weights, params, w_stack):
    """Pure-JAX reproduction of the PyTorch forward (keeps params explicitly)."""
    B, K, N, F = nb_features.shape
    nk, _, opk = w_stack.shape
    w = nb_weights * params.reshape(1, 1, 1, nk)                   # (B,K,N,nk)
    w = w / jnp.sum(w, axis=2, keepdims=True)
    weighted = jnp.einsum('bknj,bknf->bkjf', w, nb_features,
                          precision=jax.lax.Precision.HIGHEST)     # (B,K,nk,F)
    out = jnp.einsum('bkjf,jfo->bkjo', weighted, w_stack,
                     precision=jax.lax.Precision.HIGHEST)          # (B,K,nk,opk)
    return out.reshape(B, K, nk * opk)


if __name__ == "__main__":
    # Module config: in_feat_dim=32, out_feat_dim=32, n_kernels=4, bias=False
    B = 2
    n_word = 8            # K == neighbourhood_size == n_word
    K = n_word
    N = n_word
    in_feat = 32
    n_kernels = 4
    out_feat = 32
    opk = out_feat // n_kernels

    key = jax.random.PRNGKey(0)
    k1, k2, k3, k4 = jax.random.split(key, 4)

    nb_features = jax.random.normal(k1, (B, K, N, in_feat), dtype=jnp.float32)
    # attention-like nonnegative neighbourhood weights
    nb_weights = jax.random.uniform(k2, (B, K, N, 1), dtype=jnp.float32,
                                    minval=0.05, maxval=1.0)
    # self.params ~ U(-1, 1), shape (n_kernels, 1) in torch -> stored as (1, n_kernels)
    params = jax.random.uniform(k3, (1, n_kernels), dtype=jnp.float32,
                                minval=-1.0, maxval=1.0)
    # nn.Linear(in_feat, opk).weight is (opk, in_feat); y = x @ W.T, so store W.T directly
    w_stack = jax.random.normal(k4, (n_kernels, in_feat, opk),
                                dtype=jnp.float32) * 0.1

    out = text_query_graph_convolution(nb_features, nb_weights, params, w_stack)
    out = jax.block_until_ready(out)

    ref = jax.block_until_ready(_reference(nb_features, nb_weights, params, w_stack))

    assert out.shape == (B, K, out_feat), out.shape
    np.testing.assert_allclose(np.asarray(out), np.asarray(ref),
                               rtol=1e-4, atol=1e-4)
    print("KERNEL_OK")
</pallas_src>

<mosaic_0001>
module attributes {stable_mosaic.version = 11 : i64} {
  func.func @_tqgc_kernel(%arg0: i32, %arg1: memref<16x8xf32, #tpu.memory_space<vmem>>, %arg2: memref<16x8x32xf32, #tpu.memory_space<vmem>>, %arg3: memref<32x32xf32, #tpu.memory_space<vmem>>, %arg4: memref<16x32xf32, #tpu.memory_space<vmem>>) attributes {dimension_semantics = [#tpu.dimension_semantics<parallel>], iteration_bounds = array<i64: 1>, scalar_prefetch = 0 : i64, scratch_operands = 0 : i64, tpu.core_type = #tpu.core_type<tc>, window_params = [{transform_indices = @transform_0, window_bounds = array<i64: 16, 8>}, {transform_indices = @transform_1, window_bounds = array<i64: 16, 8, 32>}, {pipeline_mode = #tpu.pipeline_mode<synchronous>, transform_indices = @transform_2, window_bounds = array<i64: 32, 32>}, {transform_indices = @transform_3, window_bounds = array<i64: 16, 32>}]} {
    %c0 = arith.constant 0 : index
    %c0_0 = arith.constant 0 : index
    %0 = vector.load %arg1[%c0, %c0_0] : memref<16x8xf32, #tpu.memory_space<vmem>>, vector<16x8xf32>
    %cst = arith.constant dense<0.000000e+00> : vector<16xf32>
    %1 = vector.multi_reduction <add>, %0, %cst [1] : vector<16x8xf32> to vector<16xf32>
    %2 = vector.shape_cast %1 : vector<16xf32> to vector<16x1xf32>
    %3 = vector.broadcast %2 : vector<16x1xf32> to vector<16x8xf32>
    %4 = arith.divf %0, %3 : vector<16x8xf32>
    %c0_1 = arith.constant 0 : index
    %c0_2 = arith.constant 0 : index
    %c0_3 = arith.constant 0 : index
    %5 = vector.load %arg2[%c0_1, %c0_2, %c0_3] : memref<16x8x32xf32, #tpu.memory_space<vmem>>, vector<16x8x32xf32>
    %6 = vector.shape_cast %4 : vector<16x8xf32> to vector<16x8x1xf32>
    %7 = vector.broadcast %6 : vector<16x8x1xf32> to vector<16x8x32xf32>
    %8 = arith.mulf %7, %5 : vector<16x8x32xf32>
    %cst_4 = arith.constant dense<0.000000e+00> : vector<16x32xf32>
    %9 = vector.multi_reduction <add>, %8, %cst_4 [1] : vector<16x8x32xf32> to vector<16x32xf32>
    %c0_5 = arith.constant 0 : index
    %c0_6 = arith.constant 0 : index
    %10 = vector.load %arg3[%c0_5, %c0_6] : memref<32x32xf32, #tpu.memory_space<vmem>>, vector<32x32xf32>
    %cst_7 = arith.constant dense<0.000000e+00> : vector<16x32xf32>
    %11 = tpu.matmul %9, %10, %cst_7 {dimension_numbers = #tpu.dot_dimension_numbers<[1], [0], [0], [1], [0, 0, 1, 1], [], []>} : vector<16x32xf32>, vector<32x32xf32>, vector<16x32xf32> -> vector<16x32xf32>
    %c0_8 = arith.constant 0 : index
    %c0_9 = arith.constant 0 : index
    %12 = vector.load %arg4[%c0_8, %c0_9] : memref<16x32xf32, #tpu.memory_space<vmem>>, vector<16x32xf32>
    tpu.vector_store %arg4[%c0_8, %c0_9], %11 {strides = array<i32>} : memref<16x32xf32, #tpu.memory_space<vmem>>, vector<16x32xf32>,
    return
  }
  func.func @transform_0(%arg0: i32) -> (i32, i32) {
    %c0_i32 = arith.constant 0 : i32
    %c0_i32_0 = arith.constant 0 : i32
    return %arg0, %c0_i32 : i32, i32
  }
  func.func @transform_1(%arg0: i32) -> (i32, i32, i32) {
    %c0_i32 = arith.constant 0 : i32
    %c0_i32_0 = arith.constant 0 : i32
    %c0_i32_1 = arith.constant 0 : i32
    return %arg0, %c0_i32, %c0_i32_0 : i32, i32, i32
  }
  func.func @transform_2(%arg0: i32) -> (i32, i32) {
    %c0_i32 = arith.constant 0 : i32
    %c0_i32_0 = arith.constant 0 : i32
    %c0_i32_1 = arith.constant 0 : i32
    return %c0_i32, %c0_i32_0 : i32, i32
  }
  func.func @transform_3(%arg0: i32) -> (i32, i32) {
    %c0_i32 = arith.constant 0 : i32
    %c0_i32_0 = arith.constant 0 : i32
    return %arg0, %c0_i32 : i32, i32
  }
}

</mosaic_0001>

<bundles_post_ra>
// kernel: tpu_custom_call.1
= control target key start
LH: loop header
LB: loop body
LE: loop exit
PB: predicated region body
PF: predicated region fallthrough
CT: control target
= control target key end

     0   :  { %8 = vsyncpa [#allocation3], 0  ;;  %s671_s0 = inlined_call_operand.vmem [shape: f32[16,8], index: 0, kind: input, shape index: {}]   ;;  %s672_s1 = inlined_call_operand.hbm [shape: f32[16,8,32], index: 1, kind: input, shape index: {}]   ;;  %s673_s2 = inlined_call_operand.hbm [shape: f32[32,32], index: 2, kind: input, shape index: {}]   ;;  %s674_s3 = inlined_call_operand.hbm [shape: f32[16,32], index: 3, kind: output, shape index: {}]  }
   0x1   :  { %9 = vsyncpa [#allocation6], 0 }
   0x2   :  { %10 = vsyncpa [#allocation4], 0  ;;  %s561_s12 = smov [#allocation2]   ;;  %s489_s16 = scalar_lea.hbm %s672_s1, 2048 }
   0x3   :  { %s18_s13 = sshll.u32 %s561_s12, 4  ;;  %p490_p0 = scmp.ne.s32.totalorder %s672_s1, %s489_s16  ;;  %s19_s13 = int_to_ptr.vmem [resolvable:$true] %s18_s13 }
   0x4   :  { %p493_p1 = scmp.lt.u32.totalorder %s489_s16, %s672_s1 }
   0x6   :  { %p495_p2 = pnand %p493_p1, %p490_p0 }
   0x8   :  { %498 = shalt.err (!%p495_p2)
}
   0x9   :  { %s499_s21 = scalar_lea.vmem %s19_s13, 2048  ;;  %p504_p4 = scmp.lt.s32.totalorder %s19_s13, %s19_s13 }
   0xa   :  { %p500_p3 = scmp.ne.s32.totalorder %s19_s13, %s499_s21  ;;  %p505_p5 = scmp.lt.s32.totalorder %s499_s21, %s499_s21 }
   0xc   :  { %p506_p6 = por %p505_p5, %p504_p4 }
   0xe   :  { %p507_p7 = pnand %p506_p6, %p500_p3 }
  0x10   :  { %510 = shalt.err (!%p507_p7)
}
  0x11   :  { %s562_s22 = smov 128   ;;  %s563_s23 = smov 8  }
  0x12   :  { %24 = dma.hbm_to_vmem [thread:$0]  %s672_s1, 2048, %s19_s13, [#allocation3], %s562_s22, %s562_s22, %s563_s23  }
  0x13   :  { %s564_s26 = smov [#allocation5]   ;;  %s511_s30 = scalar_lea.hbm %s673_s2, 512 }
  0x14   :  { %s30_s27 = sshll.u32 %s564_s26, 4  ;;  %p512_p8 = scmp.ne.s32.totalorder %s673_s2, %s511_s30  ;;  %s31_s27 = int_to_ptr.vmem [resolvable:$true] %s30_s27 }
  0x15   :  { %p515_p9 = scmp.lt.u32.totalorder %s511_s30, %s673_s2 }
  0x17   :  { %p517_p10 = pnand %p515_p9, %p512_p8 }
  0x19   :  { %520 = shalt.err (!%p517_p10)
}
  0x1a   :  { %s521_s8 = scalar_lea.vmem %s31_s27, 512  ;;  %p526_p12 = scmp.lt.s32.totalorder %s31_s27, %s31_s27 }
  0x1b   :  { %p522_p11 = scmp.ne.s32.totalorder %s31_s27, %s521_s8  ;;  %p527_p13 = scmp.lt.s32.totalorder %s521_s8, %s521_s8 }
  0x1d   :  { %p528_p0 = por %p527_p13, %p526_p12 }
  0x1f   :  { %p529_p1 = pnand %p528_p0, %p522_p11 }
  0x21   :  { %532 = shalt.err (!%p529_p1)
}
  0x22   :  { %36 = dma.hbm_to_vmem [thread:$0]  %s673_s2, 512, %s31_s27, [#allocation6], %s562_s22, %s562_s22, %s563_s23  }
  0x23   :  { %555 = dma.done.wait [#allocation3], 2048  }
  0x24   :  { %556 = vsyncadd [#allocation3], 4294965248 }
  0x25   :  { %557 = dma.done.wait [#allocation6], 512  }
  0x26   :  { %558 = vsyncadd [#allocation6], 4294966784  ;;  %vm45_vm0 = vcmask 64512   ;;  %v43_v0 = vld [vmem:[%s671_s0] sm:$0xff]  ;;  %v44_v1 = vld [vmem:[%s671_s0 + $0x8] sm:$0xff]  ;;  %v72_v5 = vlaneseq  ;;  %vm200_vm1 = vcmask 261120  }
  0x27   :  { %v46_v2 = vsel %vm45_vm0, %v43_v0, 0.0  ;;  %v49_v3 = vsel %vm45_vm0, %v44_v1, 0.0  ;;  %v313_v35 = vld [vmem:[#allocation5] sm:$0xff]  ;;  %v314_v36 = vld [vmem:[#allocation5 + $0x8] sm:$0xff]  ;;  %v315_v39 = vld [vmem:[#allocation5 + $0x10] sm:$0xff]  ;;  %vm333_vm2 = vcmask 1041409  }
  0x28   :  { %47 = vadd.xlane.f32.xlu0 %v46_v2  ;;  %v73_v7 = vshrl.u32 %v72_v5, 7  ;;  %v472_v37 = vpack.c.bf16 %v314_v36, %v313_v35  ;;  %v316_v40 = vld [vmem:[#allocation5 + $0x18] sm:$0xff]  ;;  %v56_v42 = vld [vmem:[#allocation2] sm:$0xff]  ;;  %v58_v45 = vld [vmem:[#allocation2 + $0x10] sm:$0xff]  ;;  %vm335_vm3 = vcmask 1042434   ;;  %vm337_vm4 = vcmask 1043459  }
  0x29   :  { %v476_v41 = vpack.c.bf16 %v316_v40, %v315_v39  ;;  %v57_v46 = vld [vmem:[#allocation2 + $0x8] sm:$0xff]  ;;  %v62_v59 = vld [vmem:[#allocation2 + $0x30] sm:$0xff]  ;;  %v63_v62 = vld [vmem:[#allocation2 + $0x38] sm:$0xff]  ;;  %vm339_vm5 = vcmask 1044484   ;;  %vm341_vm6 = vcmask 1045509   ;;  %vm343_vm7 = vcmask 1046534  }
  0x2a   :  { %v88_v8 = vsub.s32 2, %v73_v7  ;;  %v74_v9 = vsub.s32 0, %v73_v7  ;;  %v109_v14 = vsub.s32 5, %v73_v7  ;;  %v81_v15 = vsub.s32 1, %v73_v7  ;;  %473 = vmatprep.subr.bf16.mxu0 %v472_v37  ;;  %v61_v52 = vld [vmem:[#allocation2 + $0x28] sm:$0xff]  ;;  %s565_s0 = smov [#allocation7]  }
  0x2b   :  { %v116_v20 = vsub.s32 6, %v73_v7  ;;  %v123_v23 = vsub.s32 7, %v73_v7  ;;  %v95_v26 = vsub.s32 3, %v73_v7  ;;  %v102_v30 = vsub.s32 4, %v73_v7  ;;  %475 = vmatpush3.bf16.msra.mxu0 %v472_v37  ;;  %v59_v7 = vld [vmem:[#allocation2 + $0x18] sm:$0xff]  ;;  %s440_s2 = sshll.u32 %s565_s0, 4  ;;  %s441_s2 = int_to_ptr.vmem [resolvable:$true] %s440_s2 }
  0x2c   :  { %50 = vadd.xlane.f32.xlu0 %v49_v3  ;;  %477 = vmatprep.subr.bf16.mxu0 %v476_v41  ;;  %vm345_vm8 = vcmask 1047559   ;;  %s533_s14 = scalar_lea.vmem %s441_s2, 256  ;;  %p538_p3 = scmp.lt.s32.totalorder %s441_s2, %s441_s2 }
  0x2d   :  { %p534_p2 = scmp.ne.s32.totalorder %s441_s2, %s533_s14  ;;  %p539_p4 = scmp.lt.s32.totalorder %s533_s14, %s533_s14 }
  0x2f   :  { %479 = vmatpush3.bf16.msra.mxu0 %v476_v41  ;;  %p540_p5 = por %p539_p4, %p538_p3 }
  0x31   :  { %p541_p6 = pnand %p540_p5, %p534_p2 }
  0xb5   :  { %v48_v4 = vpop.xlane.xlu0 %47 }
  0xb6   :  { %485 = vrcp.f32 %v48_v4 }
  0xb9   :  { %v51_v6 = vpop.xlane.xlu0 %50 }
  0xba   :  { %487 = vrcp.f32 %v51_v6 }
  0xc0   :  { %v486_v10 = vpop.eup %485 }
  0xc1   :  { %v53_v11 = vmul.f32 %v486_v10, %v43_v0 }
  0xc3   :  { %v89_v12 = vrot.slane %v53_v11, %v88_v8  ;;  %v75_v13 = vrot.slane %v53_v11, %v74_v9  ;;  %v110_v18 = vrot.slane %v53_v11, %v109_v14  ;;  %v82_v19 = vrot.slane %v53_v11, %v81_v15 }
  0xc4   :  { %v488_v16 = vpop.eup %487  ;;  %v117_v22 = vrot.slane %v53_v11, %v116_v20  ;;  %v124_v24 = vrot.slane %v53_v11, %v123_v23  ;;  %v96_v28 = vrot.slane %v53_v11, %v95_v26  ;;  %v103_v31 = vrot.slane %v53_v11, %v102_v30 }
  0xc5   :  { %v55_v17 = vmul.f32 %v488_v16, %v44_v1  ;;  %91 = vbcast.lane.b32.xlu0 %v89_v12, 256  ;;  %77 = vbcast.lane.b32.xlu1 %v75_v13, 256  ;;  %v65_v12 = vld [vmem:[#allocation2 + $0x48] sm:$0xff] }
  0xc7   :  { %v131_v21 = vrot.slane %v55_v17, %v74_v9  ;;  %v138_v25 = vrot.slane %v55_v17, %v81_v15  ;;  %v180_v27 = vrot.slane %v55_v17, %v123_v23  ;;  %v145_v29 = vrot.slane %v55_v17, %v88_v8  ;;  %v64_v9 = vld [vmem:[#allocation2 + $0x40] sm:$0xff] }
  0xc8   :  { %v152_v32 = vrot.slane %v55_v17, %v95_v26  ;;  %v159_v33 = vrot.slane %v55_v17, %v102_v30  ;;  %v166_v34 = vrot.slane %v55_v17, %v109_v14  ;;  %v173_v38 = vrot.slane %v55_v17, %v116_v20 }
  0xc9   :  { %112 = vbcast.lane.b32.xlu0 %v110_v18, 256  ;;  %84 = vbcast.lane.b32.xlu1 %v82_v19, 256  ;;  %v66_v19 = vld [vmem:[#allocation2 + $0x50] sm:$0xff] }
  0xcd   :  { %119 = vbcast.lane.b32.xlu0 %v117_v22, 256  ;;  %133 = vbcast.lane.b32.xlu1 %v131_v21, 256 }
  0xd1   :  { %126 = vbcast.lane.b32.xlu0 %v124_v24, 256  ;;  %140 = vbcast.lane.b32.xlu1 %v138_v25, 256 }
  0xd5   :  { %182 = vbcast.lane.b32.xlu0 %v180_v27, 256  ;;  %98 = vbcast.lane.b32.xlu1 %v96_v28, 256 }
  0xd9   :  { %147 = vbcast.lane.b32.xlu1 %v145_v29, 256 }
  0xdd   :  { %105 = vbcast.lane.b32.xlu1 %v103_v31, 256 }
  0xe1   :  { %154 = vbcast.lane.b32.xlu1 %v152_v32, 256 }
  0xe5   :  { %161 = vbcast.lane.b32.xlu1 %v159_v33, 256  ;;  %v60_v33 = vld [vmem:[#allocation2 + $0x20] sm:$0xff] }
  0xe9   :  { %168 = vbcast.lane.b32.xlu1 %v166_v34, 256 }
  0xed   :  { %175 = vbcast.lane.b32.xlu1 %v173_v38, 256 }
 0x137   :  { %v78_v43 = vpop.permute.xlu1 %77  ;;  %v92_v44 = vpop.permute.xlu0 %91 }
 0x138   :  { %v184_v47 = vmul.f32 %v78_v43, %v56_v42  ;;  %v186_v50 = vmul.f32 %v92_v44, %v58_v45  ;;  %v71_v42 = vld [vmem:[#allocation2 + $0x78] sm:$0xff] }
 0x13a   :  { %v201_v53 = vsel %vm200_vm1, %v184_v47, 0.0  ;;  %v215_v58 = vsel %vm200_vm1, %v186_v50, 0.0 }
 0x13b   :  { %v85_v48 = vpop.permute.xlu1 %84  ;;  %v113_v49 = vpop.permute.xlu0 %112  ;;  %v202_v60 = vrot.slane %v201_v53, 4  ;;  %v216_v63 = vrot.slane %v215_v58, 4 }
 0x13c   :  { %v185_v51 = vmul.f32 %v85_v48, %v57_v46  ;;  %v189_v55 = vmul.f32 %v113_v49, %v61_v52  ;;  %v67_v49 = vld [vmem:[#allocation2 + $0x58] sm:$0xff] }
 0x13d   :  { %v203_v4 = vadd.f32 %v202_v60, %v201_v53  ;;  %v217_v10 = vadd.f32 %v216_v63, %v215_v58 }
 0x13e   :  { %v208_v54 = vsel %vm200_vm1, %v185_v51, 0.0  ;;  %v236_v0 = vsel %vm200_vm1, %v189_v55, 0.0 }
 0x13f   :  { %v134_v56 = vpop.permute.xlu1 %133  ;;  %v120_v57 = vpop.permute.xlu0 %119  ;;  %v209_v61 = vrot.slane %v208_v54, 4  ;;  %v237_v8 = vrot.slane %v236_v0, 4  ;;  %v204_v15 = vrot.slane %v203_v4, 2  ;;  %v218_v24 = vrot.slane %v217_v10, 2 }
 0x140   :  { %v190_v1 = vmul.f32 %v120_v57, %v62_v59  ;;  %v192_v17 = vmul.f32 %v134_v56, %v64_v9 }
 0x141   :  { %v210_v5 = vadd.f32 %v209_v61, %v208_v54  ;;  %v238_v20 = vadd.f32 %v237_v8, %v236_v0  ;;  %v205_v29 = vadd.f32 %v204_v15, %v203_v4  ;;  %v219_v37 = vadd.f32 %v218_v24, %v217_v10 }
 0x142   :  { %v243_v11 = vsel %vm200_vm1, %v190_v1, 0.0  ;;  %v257_v31 = vsel %vm200_vm1, %v192_v17, 0.0 }
 0x143   :  { %v141_v2 = vpop.permute.xlu1 %140  ;;  %v127_v3 = vpop.permute.xlu0 %126  ;;  %v211_v16 = vrot.slane %v210_v5, 2  ;;  %v244_v21 = vrot.slane %v243_v11, 4  ;;  %v239_v34 = vrot.slane %v238_v20, 2  ;;  %v258_v40 = vrot.slane %v257_v31, 4 }
 0x144   :  { %v191_v6 = vmul.f32 %v127_v3, %v63_v62  ;;  %v193_v22 = vmul.f32 %v141_v2, %v65_v12  ;;  %v206_v46 = vrot.slane %v205_v29, 1  ;;  %v220_v58 = vrot.slane %v219_v37, 1  ;;  %v68_v2 = vld [vmem:[#allocation2 + $0x60] sm:$0xff] }
 0x145   :  { %v212_v30 = vadd.f32 %v211_v16, %v210_v5  ;;  %v245_v35 = vadd.f32 %v244_v21, %v243_v11  ;;  %v240_v50 = vadd.f32 %v239_v34, %v238_v20  ;;  %v259_v59 = vadd.f32 %v258_v40, %v257_v31  ;;  %v69_v20 = vld [vmem:[#allocation2 + $0x68] sm:$0xff] }
 0x146   :  { %v250_v18 = vsel %vm200_vm1, %v191_v6, 0.0  ;;  %v264_v36 = vsel %vm200_vm1, %v193_v22, 0.0  ;;  %v207_v62 = vadd.f32 %v206_v46, %v205_v29  ;;  %v221_v12 = vadd.f32 %v220_v58, %v219_v37  ;;  %v70_v37 = vld [vmem:[#allocation2 + $0x70] sm:$0xff] }
 0x147   :  { %v99_v13 = vpop.permute.xlu1 %98  ;;  %v251_v27 = vrot.slane %v250_v18, 4  ;;  %v183_v43 = vpop.permute.xlu0 %182  ;;  %v213_v47 = vrot.slane %v212_v30, 1  ;;  %v265_v48 = vrot.slane %v264_v36, 4  ;;  %v246_v51 = vrot.slane %v245_v35, 2 }
 0x148   :  { %v187_v14 = vmul.f32 %v99_v13, %v59_v7  ;;  %v199_v54 = vmul.f32 %v183_v43, %v71_v42  ;;  %v241_v3 = vrot.slane %v240_v50, 1  ;;  %v260_v13 = vrot.slane %v259_v59, 2 }
 0x149   :  { %v252_v41 = vadd.f32 %v251_v27, %v250_v18  ;;  %v214_v63 = vadd.f32 %v213_v47, %v212_v30  ;;  %v266_v0 = vadd.f32 %v265_v48, %v264_v36  ;;  %v247_v4 = vadd.f32 %v246_v51, %v245_v35 }
 0x14a   :  { %v222_v23 = vsel %vm200_vm1, %v187_v14, 0.0  ;;  %v306_v7 = vsel %vm200_vm1, %v199_v54, 0.0  ;;  %v261_v30 = vadd.f32 %v260_v13, %v259_v59 }
 0x14b   :  { %v223_v25 = vrot.slane %v222_v23, 4  ;;  %v148_v26 = vpop.permute.xlu1 %147  ;;  %v253_v60 = vrot.slane %v252_v41, 2  ;;  %v334_v16 = vsel %vm333_vm2, %v214_v63, %v207_v62  ;;  %v267_v17 = vrot.slane %v266_v0, 2 }
 0x14c   :  { %v194_v28 = vmul.f32 %v148_v26, %v66_v19  ;;  %v248_v21 = vrot.slane %v247_v4, 1  ;;  %v262_v62 = vrot.slane %v261_v30, 1 }
 0x14d   :  { %v224_v32 = vadd.f32 %v223_v25, %v222_v23  ;;  %v254_v14 = vadd.f32 %v253_v60, %v252_v41  ;;  %v307_v23 = vrot.slane %v306_v7, 4  ;;  %v242_v25 = vadd.f32 %v241_v3, %v240_v50 }
 0x14e   :  { %v271_v44 = vsel %vm200_vm1, %v194_v28, 0.0  ;;  %v268_v34 = vadd.f32 %v267_v17, %v266_v0  ;;  %v249_v41 = vadd.f32 %v248_v21, %v247_v4 }
 0x14f   :  { %v225_v38 = vrot.slane %v224_v32, 2  ;;  %v106_v39 = vpop.permute.xlu1 %105  ;;  %v272_v55 = vrot.slane %v271_v44, 4 }
 0x150   :  { %v188_v45 = vmul.f32 %v106_v39, %v60_v33  ;;  %v255_v33 = vrot.slane %v254_v14, 1  ;;  %v308_v39 = vadd.f32 %v307_v23, %v306_v7 }
 0x151   :  { %v226_v52 = vadd.f32 %v225_v38, %v224_v32  ;;  %v273_v8 = vadd.f32 %v272_v55, %v271_v44  ;;  %v336_v38 = vsel %vm335_vm3, %v221_v12, %v334_v16  ;;  %v269_v55 = vrot.slane %v268_v34, 1 }
 0x152   :  { %v229_v53 = vsel %vm200_vm1, %v188_v45, 0.0  ;;  %v256_v50 = vadd.f32 %v255_v33, %v254_v14 }
 0x153   :  { %v230_v56 = vrot.slane %v229_v53, 4  ;;  %v155_v57 = vpop.permute.xlu1 %154  ;;  %v227_v5 = vrot.slane %v226_v52, 1  ;;  %v274_v26 = vrot.slane %v273_v8, 2  ;;  %v270_v3 = vadd.f32 %v269_v55, %v268_v34 }
 0x154   :  { %v195_v61 = vmul.f32 %v155_v57, %v67_v49 }
 0x155   :  { %v231_v1 = vadd.f32 %v230_v56, %v229_v53  ;;  %v228_v22 = vadd.f32 %v227_v5, %v226_v52  ;;  %v275_v43 = vadd.f32 %v274_v26, %v273_v8  ;;  %v309_v56 = vrot.slane %v308_v39, 2 }
 0x156   :  { %v278_v6 = vsel %vm200_vm1, %v195_v61, 0.0  ;;  %v263_v8 = vadd.f32 %v262_v62, %v261_v30 }
 0x157   :  { %v232_v9 = vrot.slane %v231_v1, 2  ;;  %v279_v10 = vrot.slane %v278_v6, 4  ;;  %v162_v11 = vpop.permute.xlu1 %161  ;;  %v338_v42 = vsel %vm337_vm4, %v228_v22, %v336_v38  ;;  %v276_v59 = vrot.slane %v275_v43, 1 }
 0x158   :  { %v196_v15 = vmul.f32 %v162_v11, %v68_v2  ;;  %v310_v4 = vadd.f32 %v309_v56, %v308_v39  ;;  %v347_v12 = vsel %vm333_vm2, %v270_v3, %v263_v8 }
 0x159   :  { %v233_v18 = vadd.f32 %v232_v9, %v231_v1  ;;  %v280_v19 = vadd.f32 %v279_v10, %v278_v6  ;;  %v277_v5 = vadd.f32 %v276_v59, %v275_v43 }
 0x15a   :  { %v285_v24 = vsel %vm200_vm1, %v196_v15, 0.0  ;;  %v311_v13 = vrot.slane %v310_v4, 1 }
 0x15b   :  { %v234_v27 = vrot.slane %v233_v18, 1  ;;  %v286_v28 = vrot.slane %v285_v24, 4  ;;  %v169_v29 = vpop.permute.xlu1 %168  ;;  %v281_v31 = vrot.slane %v280_v19, 2  ;;  %v348_v15 = vsel %vm335_vm3, %v277_v5, %v347_v12 }
 0x15c   :  { %v197_v32 = vmul.f32 %v169_v29, %v69_v20  ;;  %v312_v20 = vadd.f32 %v311_v13, %v310_v4 }
 0x15d   :  { %v235_v35 = vadd.f32 %v234_v27, %v233_v18  ;;  %v287_v36 = vadd.f32 %v286_v28, %v285_v24  ;;  %v282_v48 = vadd.f32 %v281_v31, %v280_v19 }
 0x15e   :  { %v292_v40 = vsel %vm200_vm1, %v197_v32, 0.0 }
 0x15f   :  { %v288_v44 = vrot.slane %v287_v36, 2  ;;  %v293_v45 = vrot.slane %v292_v40, 4  ;;  %v176_v46 = vpop.permute.xlu1 %175  ;;  %v340_v47 = vsel %vm339_vm5, %v235_v35, %v338_v42  ;;  %v283_v63 = vrot.slane %v282_v48, 1 }
 0x160   :  { %v198_v49 = vmul.f32 %v176_v46, %v70_v37  ;;  %v342_v51 = vsel %vm341_vm6, %v242_v25, %v340_v47 }
 0x161   :  { %v289_v52 = vadd.f32 %v288_v44, %v287_v36  ;;  %v294_v53 = vadd.f32 %v293_v45, %v292_v40  ;;  %v344_v54 = vsel %vm343_vm7, %v249_v41, %v342_v51  ;;  %v284_v9 = vadd.f32 %v283_v63, %v282_v48 }
 0x162   :  { %v299_v57 = vsel %vm200_vm1, %v198_v49, 0.0  ;;  %v346_v58 = vsel %vm345_vm8, %v256_v50, %v344_v54 }
 0x163   :  { %v295_v60 = vrot.slane %v294_v53, 2  ;;  %v300_v61 = vrot.slane %v299_v57, 4  ;;  %469 = vmatprep.mubr.msk.f32.mxu0 %vm200_vm1, %v346_v58  ;;  %v290_v0 = vrot.slane %v289_v52, 1  ;;  %v349_v17 = vsel %vm337_vm4, %v284_v9, %v348_v15 }
 0x165   :  { %v296_v1 = vadd.f32 %v295_v60, %v294_v53  ;;  %v301_v2 = vadd.f32 %v300_v61, %v299_v57  ;;  %v291_v10 = vadd.f32 %v290_v0, %v289_v52 }
 0x167   :  { %v297_v6 = vrot.slane %v296_v1, 1  ;;  %v302_v7 = vrot.slane %v301_v2, 2  ;;  %v350_v19 = vsel %vm339_vm5, %v291_v10, %v349_v17 }
 0x169   :  { %v303_v11 = vadd.f32 %v302_v7, %v301_v2  ;;  %v298_v14 = vadd.f32 %v297_v6, %v296_v1 }
 0x16b   :  { %v304_v16 = vrot.slane %v303_v11, 1  ;;  %v351_v21 = vsel %vm341_vm6, %v298_v14, %v350_v19 }
 0x16d   :  { %v305_v18 = vadd.f32 %v304_v16, %v303_v11 }
 0x16f   :  { %v352_v22 = vsel %vm343_vm7, %v305_v18, %v351_v21 }
 0x170   :  { %v353_v23 = vsel %vm345_vm8, %v312_v20, %v352_v22 }
 0x171   :  { %470 = vmatmul.mubr.msk.f32.vlgmr.msra.gmra.mrb[0].mxu0 %vm200_vm1, %v353_v23 }
 0x244   :  { %v471_v24 = vpop.f32.mrb[0].mxu0 }
 0x245   :  { %434 = vst.msk [vmem:[#allocation7 + $0x8] sm:$0xff] %vm200_vm1, %v471_v24  ;;  %v424_v25 = vpop.f32.mrb[1].mxu0 }
 0x246   :  { %433 = vst.msk [vmem:[#allocation7] sm:$0xff] %vm200_vm1, %v424_v25 }
 0x247   :  { %544 = shalt.err (!%p541_p6)
}
 0x248   :  { %s545_s17 = scalar_lea.hbm %s674_s3, 256 }
 0x249   :  { %p546_p7 = scmp.ne.s32.totalorder %s674_s3, %s545_s17  ;;  %p549_p8 = scmp.lt.u32.totalorder %s545_s17, %s674_s3 }
 0x24b   :  { %p551_p9 = pnand %p549_p8, %p546_p7 }
 0x24d   :  { %554 = shalt.err (!%p551_p9)
}
 0x24e   :  { %446 = dma.vmem_to_hbm [thread:$0]  %s441_s2, 256, %s674_s3, [#allocation4], %s562_s22, %s562_s22, %s563_s23  }
 0x24f   :  { %559 = dma.done.wait [#allocation4], 256  }
 0x250   :  { %560 = vsyncadd [#allocation4], 4294967040 }
 0x251   :  { %450 = vsyncpa [#allocation3], 1 }
 0x252   :  { %451 = vsyncpa [#allocation6], 1 }
 0x253   :  { %452 = vsyncpa [#allocation4], 1 }

</bundles_post_ra>
